<compile_context>
chip_gen: v7x
topology: tpu7x:2x2x1
jax: 0.10.0
libtpu: 0.0.40
codegen_flags: <defaults>
</compile_context>

<pallas_src>
import functools

import jax
import jax.numpy as jnp
from jax.experimental import pallas as pl
from jax.experimental.pallas import tpu as pltpu


# ---------------------------------------------------------------------------
# Fused decoder-step kernel (runs once per grid step t = 0..num_steps-1).
# GRU cell (nn.GRUCell semantics):
#   r  = sigmoid(x W_ir + b_ir + h W_hr + b_hr)
#   z  = sigmoid(x W_iz + b_iz + h W_hz + b_hz)
#   n  = tanh   (x W_in + b_in + r * (h W_hn + b_hn))
#   h' = (1 - z) * n + z * h
# then logits = h' W_fc + b_fc, idx = argmax(logits), x_next = emb[idx].
# ---------------------------------------------------------------------------
def _decoder_step_kernel(
    x0_ref, h0_ref, emb_ref,
    wi_ref, wh_ref, bi_ref, bh_ref,
    wfc_ref, bfc_ref,
    logits_ref, idx_ref,
    h_scr, x_scr,
):
    t = pl.program_id(0)
    B, H = h0_ref.shape
    Vp = wfc_ref.shape[1]

    # Initialize the carried state at the first step.
    @pl.when(t == 0)
    def _():
        h_scr[...] = h0_ref[...]
        x_scr[...] = x0_ref[...]

    x = x_scr[...]
    h = h_scr[...]

    # Two fused gate matmuls instead of six.
    gi = jnp.dot(x, wi_ref[...], preferred_element_type=jnp.float32) + bi_ref[...]
    gh = jnp.dot(h, wh_ref[...], preferred_element_type=jnp.float32) + bh_ref[...]

    r = jax.nn.sigmoid(gi[:, 0 * H:1 * H] + gh[:, 0 * H:1 * H])
    z = jax.nn.sigmoid(gi[:, 1 * H:2 * H] + gh[:, 1 * H:2 * H])
    n = jnp.tanh(gi[:, 2 * H:3 * H] + r * gh[:, 2 * H:3 * H])
    h_new = (1.0 - z) * n + z * h
    h_scr[...] = h_new

    # Output head: logits only (softmax is redundant for greedy selection).
    logits = (jnp.dot(h_new, wfc_ref[...], preferred_element_type=jnp.float32)
              + bfc_ref[...])
    logits_ref[0, :, :] = logits

    # In-kernel argmax (first-max tie-break) via iota + max + min.
    ids = jax.lax.broadcasted_iota(jnp.int32, (B, Vp), 1)
    m = jnp.max(logits, axis=-1, keepdims=True)
    idx_f = jnp.min(
        jnp.where(logits == m, ids.astype(jnp.float32), float(Vp)),
        axis=-1, keepdims=True)
    idx = idx_f.astype(jnp.int32)                      # (B, 1)
    idx_ref[0, :, :] = idx

    # Next-step input embedding gather via one-hot matmul on the MXU.
    onehot = (ids == idx).astype(jnp.float32)          # (B, Vp)
    x_scr[...] = jnp.dot(onehot, emb_ref[...], preferred_element_type=jnp.float32)


def _round_up(x, m):
    return (x + m - 1) // m * m


@functools.partial(jax.jit, static_argnames=("num_steps",))
def decoder_forward(sequence_embedding, embedding_dict, eos_index, params, num_steps):
    """
    sequence_embedding: (B, H) f32 -- initial hidden state (num_layers=1)
    embedding_dict:     (V, D_in)  -- embedding table
    Returns (indices (T, B) int32, logits (T, B, V) f32).
    """
    B, H = sequence_embedding.shape
    V, D_in = embedding_dict.shape
    Vp = max(_round_up(V, 128), 128)   # lane-dense logits / FC width

    emb = embedding_dict.astype(jnp.float32)
    emb_p = jnp.pad(emb, ((0, Vp - V), (0, 0)))
    wfc_p = jnp.pad(params["fc_w"], ((0, 0), (0, Vp - V)))
    bfc_p = jnp.concatenate(
        [params["fc_b"], jnp.full((1, Vp - V), -1e30, jnp.float32)], axis=1)

    # x_0 = embedding of the EOS token replicated over the batch;
    # h_0 = cat([sequence_embedding.unsqueeze(0)] * num_layers), num_layers=1.
    x0 = jnp.broadcast_to(emb[eos_index][None, :], (B, D_in)).astype(jnp.float32)
    h0 = sequence_embedding.astype(jnp.float32)

    const2 = lambda t: (0, 0)   # weights/state inputs: resident, fetched once

    logits_p, idx3 = pl.pallas_call(
        _decoder_step_kernel,
        out_shape=(
            jax.ShapeDtypeStruct((num_steps, B, Vp), jnp.float32),
            jax.ShapeDtypeStruct((num_steps, B, 1), jnp.int32),
        ),
        grid_spec=pltpu.PrefetchScalarGridSpec(
            num_scalar_prefetch=0,
            grid=(num_steps,),
            in_specs=[
                pl.BlockSpec((B, D_in), const2),        # x0
                pl.BlockSpec((B, H), const2),           # h0
                pl.BlockSpec((Vp, D_in), const2),       # embedding table (padded)
                pl.BlockSpec((D_in, 3 * H), const2),    # W_i = [W_ir|W_iz|W_in]
                pl.BlockSpec((H, 3 * H), const2),       # W_h = [W_hr|W_hz|W_hn]
                pl.BlockSpec((1, 3 * H), const2),       # b_i
                pl.BlockSpec((1, 3 * H), const2),       # b_h
                pl.BlockSpec((H, Vp), const2),          # W_fc (padded)
                pl.BlockSpec((1, Vp), const2),          # b_fc (padded with -1e30)
            ],
            out_specs=(
                pl.BlockSpec((1, B, Vp), lambda t: (t, 0, 0)),  # per-step logits
                pl.BlockSpec((1, B, 1), lambda t: (t, 0, 0)),   # per-step indices
            ),
            scratch_shapes=[
                pltpu.VMEM((B, H), jnp.float32),     # carried hidden state
                pltpu.VMEM((B, D_in), jnp.float32),  # carried input embedding
            ],
        ),
        compiler_params=pltpu.CompilerParams(
            dimension_semantics=("arbitrary",)),  # serial recurrence over time
    )(x0, h0, emb_p, params["w_i"], params["w_h"], params["b_i"],
      params["b_h"], wfc_p, bfc_p)

    indices = idx3[:, :, 0]
    logits = logits_p[:, :, :V]
    return indices, logits


# ---------------------------------------------------------------------------
# Pure-JAX reference (same greedy-argmax semantics) for a correctness check.
# ---------------------------------------------------------------------------
def decoder_forward_ref(sequence_embedding, embedding_dict, eos_index, params, num_steps):
    B, H = sequence_embedding.shape
    hi = jax.lax.Precision.HIGHEST
    x = jnp.broadcast_to(
        embedding_dict[eos_index][None, :], (B, embedding_dict.shape[1])
    ).astype(jnp.float32)
    h = sequence_embedding.astype(jnp.float32)
    idx_seq, log_seq = [], []
    for _ in range(num_steps):
        gi = jnp.dot(x, params["w_i"], precision=hi) + params["b_i"]
        gh = jnp.dot(h, params["w_h"], precision=hi) + params["b_h"]
        r = jax.nn.sigmoid(gi[:, :H] + gh[:, :H])
        z = jax.nn.sigmoid(gi[:, H:2 * H] + gh[:, H:2 * H])
        n = jnp.tanh(gi[:, 2 * H:] + r * gh[:, 2 * H:])
        h = (1.0 - z) * n + z * h
        logits = jnp.dot(h, params["fc_w"], precision=hi) + params["fc_b"]
        idx = jnp.argmax(logits, axis=-1).astype(jnp.int32)
        idx_seq.append(idx)
        log_seq.append(logits)
        x = jnp.take(embedding_dict, idx, axis=0).astype(jnp.float32)
    return jnp.stack(idx_seq), jnp.stack(log_seq)


# ---------------------------------------------------------------------------
# Deterministic parameter initialization (synthetic, no checkpoint load).
# ---------------------------------------------------------------------------
def init_params(key, input_dim, hidden_dim, output_dim):
    keys = jax.random.split(key, 6)
    s = 0.1

    def mat(k, shape):
        return (s * jax.random.normal(k, shape)).astype(jnp.float32)

    return {
        "w_i": mat(keys[0], (input_dim, 3 * hidden_dim)),   # [W_ir|W_iz|W_in]
        "w_h": mat(keys[1], (hidden_dim, 3 * hidden_dim)),  # [W_hr|W_hz|W_hn]
        "b_i": mat(keys[2], (1, 3 * hidden_dim)),           # [b_ir|b_iz|b_in]
        "b_h": mat(keys[3], (1, 3 * hidden_dim)),           # [b_hr|b_hz|b_hn]
        "fc_w": mat(keys[4], (hidden_dim, output_dim)),
        "fc_b": mat(keys[5], (1, output_dim)),
    }


if __name__ == "__main__":
    # Small shapes consistent with the module's forward:
    #   batch=2, input_dim=32, hidden_dim=32, vocab (output_dim)=64, steps=6
    batch = 2
    input_dim = 32
    hidden_dim = 32
    output_dim = 64
    num_steps = 6
    eos_index = 0

    key = jax.random.PRNGKey(0)
    k_emb, k_seq, k_par = jax.random.split(key, 3)

    embedding_dict = jax.random.normal(k_emb, (output_dim, input_dim), dtype=jnp.float32)
    sequence_embedding = jax.random.normal(k_seq, (batch, hidden_dim), dtype=jnp.float32)
    params = init_params(k_par, input_dim, hidden_dim, output_dim)

    indices, logits = decoder_forward(
        sequence_embedding, embedding_dict, eos_index, params, num_steps
    )
    jax.block_until_ready((indices, logits))

    assert indices.shape == (num_steps, batch)
    assert logits.shape == (num_steps, batch, output_dim)
    assert bool(jnp.all(jnp.isfinite(logits)))

    # Cross-check against the pure-JAX reference.
    ref_idx, ref_logits = decoder_forward_ref(
        sequence_embedding, embedding_dict, eos_index, params, num_steps
    )
    assert bool(jnp.all(indices == ref_idx))
    assert bool(jnp.allclose(logits, ref_logits, atol=2e-3, rtol=2e-3))

    print("KERNEL_OK")
</pallas_src>

<mosaic_0001>
module attributes {stable_mosaic.version = 11 : i64} {
  func.func @_decoder_step_kernel(%arg0: i32, %arg1: memref<2x32xf32, #tpu.memory_space<vmem>>, %arg2: memref<2x32xf32, #tpu.memory_space<vmem>>, %arg3: memref<128x32xf32, #tpu.memory_space<vmem>>, %arg4: memref<32x96xf32, #tpu.memory_space<vmem>>, %arg5: memref<32x96xf32, #tpu.memory_space<vmem>>, %arg6: memref<1x96xf32, #tpu.memory_space<vmem>>, %arg7: memref<1x96xf32, #tpu.memory_space<vmem>>, %arg8: memref<32x128xf32, #tpu.memory_space<vmem>>, %arg9: memref<1x128xf32, #tpu.memory_space<vmem>>, %arg10: memref<1x2x128xf32, #tpu.memory_space<vmem>>, %arg11: memref<1x2x1xi32, #tpu.memory_space<vmem>>, %arg12: memref<2x32xf32, #tpu.memory_space<vmem>>, %arg13: memref<2x32xf32, #tpu.memory_space<vmem>>) attributes {dimension_semantics = [#tpu.dimension_semantics<arbitrary>], iteration_bounds = array<i64: 6>, scalar_prefetch = 0 : i64, scratch_operands = 2 : i64, tpu.core_type = #tpu.core_type<tc>, window_params = [{pipeline_mode = #tpu.pipeline_mode<synchronous>, transform_indices = @transform_0, window_bounds = array<i64: 2, 32>}, {pipeline_mode = #tpu.pipeline_mode<synchronous>, transform_indices = @transform_1, window_bounds = array<i64: 2, 32>}, {pipeline_mode = #tpu.pipeline_mode<synchronous>, transform_indices = @transform_2, window_bounds = array<i64: 128, 32>}, {pipeline_mode = #tpu.pipeline_mode<synchronous>, transform_indices = @transform_3, window_bounds = array<i64: 32, 96>}, {pipeline_mode = #tpu.pipeline_mode<synchronous>, transform_indices = @transform_4, window_bounds = array<i64: 32, 96>}, {pipeline_mode = #tpu.pipeline_mode<synchronous>, transform_indices = @transform_5, window_bounds = array<i64: 1, 96>}, {pipeline_mode = #tpu.pipeline_mode<synchronous>, transform_indices = @transform_6, window_bounds = array<i64: 1, 96>}, {pipeline_mode = #tpu.pipeline_mode<synchronous>, transform_indices = @transform_7, window_bounds = array<i64: 32, 128>}, {pipeline_mode = #tpu.pipeline_mode<synchronous>, transform_indices = @transform_8, window_bounds = array<i64: 1, 128>}, {transform_indices = @transform_9, window_bounds = array<i64: 1, 2, 128>}, {transform_indices = @transform_10, window_bounds = array<i64: 1, 2, 1>}]} {
    %c0_i32 = arith.constant 0 : i32
    %0 = arith.cmpi eq, %arg0, %c0_i32 : i32
    %1 = arith.extui %0 : i1 to i32
    %c0_i32_0 = arith.constant 0 : i32
    %2 = arith.cmpi ne, %1, %c0_i32_0 : i32
    scf.if %2 {
      %c0_37 = arith.constant 0 : index
      %c0_38 = arith.constant 0 : index
      %71 = vector.load %arg2[%c0_37, %c0_38] : memref<2x32xf32, #tpu.memory_space<vmem>>, vector<2x32xf32>
      %c0_39 = arith.constant 0 : index
      %c0_40 = arith.constant 0 : index
      %72 = vector.load %arg12[%c0_39, %c0_40] : memref<2x32xf32, #tpu.memory_space<vmem>>, vector<2x32xf32>
      tpu.vector_store %arg12[%c0_39, %c0_40], %71 {strides = array<i32>} : memref<2x32xf32, #tpu.memory_space<vmem>>, vector<2x32xf32>,
      %c0_41 = arith.constant 0 : index
      %c0_42 = arith.constant 0 : index
      %73 = vector.load %arg1[%c0_41, %c0_42] : memref<2x32xf32, #tpu.memory_space<vmem>>, vector<2x32xf32>
      %c0_43 = arith.constant 0 : index
      %c0_44 = arith.constant 0 : index
      %74 = vector.load %arg13[%c0_43, %c0_44] : memref<2x32xf32, #tpu.memory_space<vmem>>, vector<2x32xf32>
      tpu.vector_store %arg13[%c0_43, %c0_44], %73 {strides = array<i32>} : memref<2x32xf32, #tpu.memory_space<vmem>>, vector<2x32xf32>,
    } else {
    }
    %c0 = arith.constant 0 : index
    %c0_1 = arith.constant 0 : index
    %3 = vector.load %arg13[%c0, %c0_1] : memref<2x32xf32, #tpu.memory_space<vmem>>, vector<2x32xf32>
    %c0_2 = arith.constant 0 : index
    %c0_3 = arith.constant 0 : index
    %4 = vector.load %arg12[%c0_2, %c0_3] : memref<2x32xf32, #tpu.memory_space<vmem>>, vector<2x32xf32>
    %c0_4 = arith.constant 0 : index
    %c0_5 = arith.constant 0 : index
    %5 = vector.load %arg4[%c0_4, %c0_5] : memref<32x96xf32, #tpu.memory_space<vmem>>, vector<32x96xf32>
    %cst = arith.constant dense<0.000000e+00> : vector<2x96xf32>
    %6 = tpu.matmul %3, %5, %cst {dimension_numbers = #tpu.dot_dimension_numbers<[1], [0], [0], [1], [0, 0, 1, 1], [], []>} : vector<2x32xf32>, vector<32x96xf32>, vector<2x96xf32> -> vector<2x96xf32>
    %c0_6 = arith.constant 0 : index
    %c0_7 = arith.constant 0 : index
    %7 = vector.load %arg6[%c0_6, %c0_7] : memref<1x96xf32, #tpu.memory_space<vmem>>, vector<1x96xf32>
    %8 = vector.broadcast %7 : vector<1x96xf32> to vector<2x96xf32>
    %9 = arith.addf %6, %8 : vector<2x96xf32>
    %c0_8 = arith.constant 0 : index
    %c0_9 = arith.constant 0 : index
    %10 = vector.load %arg5[%c0_8, %c0_9] : memref<32x96xf32, #tpu.memory_space<vmem>>, vector<32x96xf32>
    %cst_10 = arith.constant dense<0.000000e+00> : vector<2x96xf32>
    %11 = tpu.matmul %4, %10, %cst_10 {dimension_numbers = #tpu.dot_dimension_numbers<[1], [0], [0], [1], [0, 0, 1, 1], [], []>} : vector<2x32xf32>, vector<32x96xf32>, vector<2x96xf32> -> vector<2x96xf32>
    %c0_11 = arith.constant 0 : index
    %c0_12 = arith.constant 0 : index
    %12 = vector.load %arg7[%c0_11, %c0_12] : memref<1x96xf32, #tpu.memory_space<vmem>>, vector<1x96xf32>
    %13 = vector.broadcast %12 : vector<1x96xf32> to vector<2x96xf32>
    %14 = arith.addf %11, %13 : vector<2x96xf32>
    %15 = vector.extract_strided_slice %9 {offsets = [0, 0], sizes = [2, 32], strides = [1, 1]} : vector<2x96xf32> to vector<2x32xf32>
    %16 = vector.extract_strided_slice %14 {offsets = [0, 0], sizes = [2, 32], strides = [1, 1]} : vector<2x96xf32> to vector<2x32xf32>
    %17 = arith.addf %15, %16 : vector<2x32xf32>
    %18 = arith.negf %17 : vector<2x32xf32>
    %19 = math.exp %18 : vector<2x32xf32>
    %cst_13 = arith.constant 1.000000e+00 : f32
    %20 = vector.broadcast %cst_13 : f32 to vector<2x32xf32>
    %21 = arith.addf %20, %19 : vector<2x32xf32>
    %22 = arith.divf %20, %21 : vector<2x32xf32>
    %23 = vector.extract_strided_slice %9 {offsets = [0, 32], sizes = [2, 32], strides = [1, 1]} : vector<2x96xf32> to vector<2x32xf32>
    %24 = vector.extract_strided_slice %14 {offsets = [0, 32], sizes = [2, 32], strides = [1, 1]} : vector<2x96xf32> to vector<2x32xf32>
    %25 = arith.addf %23, %24 : vector<2x32xf32>
    %26 = arith.negf %25 : vector<2x32xf32>
    %27 = math.exp %26 : vector<2x32xf32>
    %cst_14 = arith.constant 1.000000e+00 : f32
    %28 = vector.broadcast %cst_14 : f32 to vector<2x32xf32>
    %29 = arith.addf %28, %27 : vector<2x32xf32>
    %30 = arith.divf %28, %29 : vector<2x32xf32>
    %31 = vector.extract_strided_slice %9 {offsets = [0, 64], sizes = [2, 32], strides = [1, 1]} : vector<2x96xf32> to vector<2x32xf32>
    %32 = vector.extract_strided_slice %14 {offsets = [0, 64], sizes = [2, 32], strides = [1, 1]} : vector<2x96xf32> to vector<2x32xf32>
    %33 = arith.mulf %22, %32 : vector<2x32xf32>
    %34 = arith.addf %31, %33 : vector<2x32xf32>
    %35 = math.tanh %34 : vector<2x32xf32>
    %cst_15 = arith.constant 1.000000e+00 : f32
    %36 = vector.broadcast %cst_15 : f32 to vector<2x32xf32>
    %37 = arith.subf %36, %30 : vector<2x32xf32>
    %38 = arith.mulf %37, %35 : vector<2x32xf32>
    %39 = arith.mulf %30, %4 : vector<2x32xf32>
    %40 = arith.addf %38, %39 : vector<2x32xf32>
    %c0_16 = arith.constant 0 : index
    %c0_17 = arith.constant 0 : index
    %41 = vector.load %arg12[%c0_16, %c0_17] : memref<2x32xf32, #tpu.memory_space<vmem>>, vector<2x32xf32>
    tpu.vector_store %arg12[%c0_16, %c0_17], %40 {strides = array<i32>} : memref<2x32xf32, #tpu.memory_space<vmem>>, vector<2x32xf32>,
    %c0_18 = arith.constant 0 : index
    %c0_19 = arith.constant 0 : index
    %42 = vector.load %arg8[%c0_18, %c0_19] : memref<32x128xf32, #tpu.memory_space<vmem>>, vector<32x128xf32>
    %cst_20 = arith.constant dense<0.000000e+00> : vector<2x128xf32>
    %43 = tpu.matmul %40, %42, %cst_20 {dimension_numbers = #tpu.dot_dimension_numbers<[1], [0], [0], [1], [0, 0, 1, 1], [], []>} : vector<2x32xf32>, vector<32x128xf32>, vector<2x128xf32> -> vector<2x128xf32>
    %c0_21 = arith.constant 0 : index
    %c0_22 = arith.constant 0 : index
    %44 = vector.load %arg9[%c0_21, %c0_22] : memref<1x128xf32, #tpu.memory_space<vmem>>, vector<1x128xf32>
    %45 = vector.broadcast %44 : vector<1x128xf32> to vector<2x128xf32>
    %46 = arith.addf %43, %45 : vector<2x128xf32>
    %c0_23 = arith.constant 0 : index
    %c0_24 = arith.constant 0 : index
    %c0_25 = arith.constant 0 : index
    %47 = vector.load %arg10[%c0_23, %c0_24, %c0_25] : memref<1x2x128xf32, #tpu.memory_space<vmem>>, vector<1x2x128xf32>
    %48 = vector.shape_cast %47 : vector<1x2x128xf32> to vector<2x128xf32>
    %49 = vector.shape_cast %46 : vector<2x128xf32> to vector<1x2x128xf32>
    tpu.vector_store %arg10[%c0_23, %c0_24, %c0_25], %49 {strides = array<i32>} : memref<1x2x128xf32, #tpu.memory_space<vmem>>, vector<1x2x128xf32>,
    %50 = tpu.iota {dimensions = array<i32: 1>} : vector<2x128xi32>
    %cst_26 = arith.constant dense<0xFF800000> : vector<2xf32>
    %51 = vector.multi_reduction <maximumf>, %46, %cst_26 [1] : vector<2x128xf32> to vector<2xf32>
    %52 = vector.shape_cast %51 : vector<2xf32> to vector<2x1xf32>
    %53 = vector.broadcast %52 : vector<2x1xf32> to vector<2x128xf32>
    %54 = arith.cmpf oeq, %46, %53 : vector<2x128xf32>
    %55 = arith.sitofp %50 : vector<2x128xi32> to vector<2x128xf32>
    %cst_27 = arith.constant 1.280000e+02 : f32
    %56 = vector.broadcast %cst_27 : f32 to vector<2x128xf32>
    %57 = arith.select %54, %55, %56 : vector<2x128xi1>, vector<2x128xf32>
    %cst_28 = arith.constant dense<0x7F800000> : vector<2xf32>
    %58 = vector.multi_reduction <minimumf>, %57, %cst_28 [1] : vector<2x128xf32> to vector<2xf32>
    %59 = vector.shape_cast %58 : vector<2xf32> to vector<2x1xf32>
    %60 = arith.fptosi %59 : vector<2x1xf32> to vector<2x1xi32>
    %c0_29 = arith.constant 0 : index
    %c0_30 = arith.constant 0 : index
    %c0_31 = arith.constant 0 : index
    %61 = vector.load %arg11[%c0_29, %c0_30, %c0_31] : memref<1x2x1xi32, #tpu.memory_space<vmem>>, vector<1x2x1xi32>
    %62 = vector.shape_cast %61 : vector<1x2x1xi32> to vector<2x1xi32>
    %63 = vector.shape_cast %60 : vector<2x1xi32> to vector<1x2x1xi32>
    tpu.vector_store %arg11[%c0_29, %c0_30, %c0_31], %63 {strides = array<i32>} : memref<1x2x1xi32, #tpu.memory_space<vmem>>, vector<1x2x1xi32>,
    %64 = vector.broadcast %60 : vector<2x1xi32> to vector<2x128xi32>
    %65 = arith.cmpi eq, %50, %64 : vector<2x128xi32>
    %66 = arith.extui %65 : vector<2x128xi1> to vector<2x128xi32>
    %67 = arith.sitofp %66 : vector<2x128xi32> to vector<2x128xf32>
    %c0_32 = arith.constant 0 : index
    %c0_33 = arith.constant 0 : index
    %68 = vector.load %arg3[%c0_32, %c0_33] : memref<128x32xf32, #tpu.memory_space<vmem>>, vector<128x32xf32>
    %cst_34 = arith.constant dense<0.000000e+00> : vector<2x32xf32>
    %69 = tpu.matmul %67, %68, %cst_34 {dimension_numbers = #tpu.dot_dimension_numbers<[1], [0], [0], [1], [0, 0, 1, 1], [], []>} : vector<2x128xf32>, vector<128x32xf32>, vector<2x32xf32> -> vector<2x32xf32>
    %c0_35 = arith.constant 0 : index
    %c0_36 = arith.constant 0 : index
    %70 = vector.load %arg13[%c0_35, %c0_36] : memref<2x32xf32, #tpu.memory_space<vmem>>, vector<2x32xf32>
    tpu.vector_store %arg13[%c0_35, %c0_36], %69 {strides = array<i32>} : memref<2x32xf32, #tpu.memory_space<vmem>>, vector<2x32xf32>,
    return
  }
  func.func @transform_0(%arg0: i32) -> (i32, i32) {
    %c0_i32 = arith.constant 0 : i32
    %c0_i32_0 = arith.constant 0 : i32
    %c0_i32_1 = arith.constant 0 : i32
    return %c0_i32, %c0_i32_0 : i32, i32
  }
  func.func @transform_1(%arg0: i32) -> (i32, i32) {
    %c0_i32 = arith.constant 0 : i32
    %c0_i32_0 = arith.constant 0 : i32
    %c0_i32_1 = arith.constant 0 : i32
    return %c0_i32, %c0_i32_0 : i32, i32
  }
  func.func @transform_2(%arg0: i32) -> (i32, i32) {
    %c0_i32 = arith.constant 0 : i32
    %c0_i32_0 = arith.constant 0 : i32
    %c0_i32_1 = arith.constant 0 : i32
    return %c0_i32, %c0_i32_0 : i32, i32
  }
  func.func @transform_3(%arg0: i32) -> (i32, i32) {
    %c0_i32 = arith.constant 0 : i32
    %c0_i32_0 = arith.constant 0 : i32
    %c0_i32_1 = arith.constant 0 : i32
    return %c0_i32, %c0_i32_0 : i32, i32
  }
  func.func @transform_4(%arg0: i32) -> (i32, i32) {
    %c0_i32 = arith.constant 0 : i32
    %c0_i32_0 = arith.constant 0 : i32
    %c0_i32_1 = arith.constant 0 : i32
    return %c0_i32, %c0_i32_0 : i32, i32
  }
  func.func @transform_5(%arg0: i32) -> (i32, i32) {
    %c0_i32 = arith.constant 0 : i32
    %c0_i32_0 = arith.constant 0 : i32
    %c0_i32_1 = arith.constant 0 : i32
    return %c0_i32, %c0_i32_0 : i32, i32
  }
  func.func @transform_6(%arg0: i32) -> (i32, i32) {
    %c0_i32 = arith.constant 0 : i32
    %c0_i32_0 = arith.constant 0 : i32
    %c0_i32_1 = arith.constant 0 : i32
    return %c0_i32, %c0_i32_0 : i32, i32
  }
  func.func @transform_7(%arg0: i32) -> (i32, i32) {
    %c0_i32 = arith.constant 0 : i32
    %c0_i32_0 = arith.constant 0 : i32
    %c0_i32_1 = arith.constant 0 : i32
    return %c0_i32, %c0_i32_0 : i32, i32
  }
  func.func @transform_8(%arg0: i32) -> (i32, i32) {
    %c0_i32 = arith.constant 0 : i32
    %c0_i32_0 = arith.constant 0 : i32
    %c0_i32_1 = arith.constant 0 : i32
    return %c0_i32, %c0_i32_0 : i32, i32
  }
  func.func @transform_9(%arg0: i32) -> (i32, i32, i32) {
    %c0_i32 = arith.constant 0 : i32
    %c0_i32_0 = arith.constant 0 : i32
    %c0_i32_1 = arith.constant 0 : i32
    return %arg0, %c0_i32, %c0_i32_0 : i32, i32, i32
  }
  func.func @transform_10(%arg0: i32) -> (i32, i32, i32) {
    %c0_i32 = arith.constant 0 : i32
    %c0_i32_0 = arith.constant 0 : i32
    %c0_i32_1 = arith.constant 0 : i32
    return %arg0, %c0_i32, %c0_i32_0 : i32, i32, i32
  }
}

</mosaic_0001>

<bundles_post_ra>
// kernel: decoder_forward.1
= control target key start
LH: loop header
LB: loop body
LE: loop exit
PB: predicated region body
PF: predicated region fallthrough
CT: control target
= control target key end

     0   :  { %s1420_s0 = inlined_call_operand.vmem [shape: f32[2,32], index: 0, kind: input, shape index: {}]   ;;  %s1421_s1 = inlined_call_operand.vmem [shape: f32[2,32], index: 1, kind: input, shape index: {}]   ;;  %s1422_s2 = inlined_call_operand.vmem [shape: f32[128,32], index: 2, kind: input, shape index: {}]   ;;  %s1423_s3 = inlined_call_operand.vmem [shape: f32[32,96], index: 3, kind: input, shape index: {}]   ;;  %s1424_s4 = inlined_call_operand.vmem [shape: f32[32,96], index: 4, kind: input, shape index: {}]   ;;  %s1425_s5 = inlined_call_operand.vmem [shape: f32[1,96], index: 5, kind: input, shape index: {}]   ;;  %s1426_s6 = inlined_call_operand.vmem [shape: f32[1,96], index: 6, kind: input, shape index: {}]   ;;  %s1427_s7 = inlined_call_operand.vmem [shape: f32[32,128], index: 7, kind: input, shape index: {}]   ;;  %s1428_s8 = inlined_call_operand.vmem [shape: f32[1,128], index: 8, kind: input, shape index: {}]   ;;  %s1429_s9 = inlined_call_operand.hbm [shape: f32[6,2,128], index: 9, kind: output, shape index: {0}]   ;;  %s1430_s10 = inlined_call_operand.vmem [shape: s32[6,2,1], index: 10, kind: output, shape index: {1}]  }
   0x1   :  { %1432 = sst [smem:[#allocation7_spill]] %s1420_s0 }
   0x2   :  { %1433 = sst [smem:[#allocation8_spill]] %s1430_s10 }
   0x3   :  { %16 = vsyncpa [#allocation5], 0 }
   0x4   :  { %18 = vsyncpa [#allocation5 + $0x1], 0  ;;  %s1187_s13 = smov 0   ;;  %s1189_s14 = smov 0  }
   0x5   :  { %s1191_s15 = smov 0   ;;  %s1193_s16 = smov 0  }
   0x6 LB: > { %s1208_s17 = sadd.s32 4294967295, %s1122_s16   ;;  %s845_s18 = sadd.s32 4294967294, %s1122_s16   ;;  %s1122_s16 = sphi %s1193_s16, %s1444_s16   ;;  %s1118_s15 = sphi %s1191_s15, %s1443_s15   ;;  %s1114_s14 = sphi %s1189_s14, %s1442_s14   ;;  %s1110_s13 = sphi %s1187_s13, %s1441_s13  }
   0x7   : > { %s1212_s19 = sadd.s32 1, %s1122_s16   ;;  %s220_s20 = sadd.s32 1, %s1118_s15 }
   0x8   : > { %s217_s21 = ssub.s32 %s1122_s16, %s1212_s19  ;;  %p230_p0 = scmp.ne.s32.totalorder %s1118_s15, %s1114_s14 }
   0x9   : > { %p218_p1 = scmp.eq.s32.totalorder %s217_s21, 0  ;;  %p231_p2 = scmp.eq.s32.totalorder %s1208_s17, 5 }
   0xa   : > { %p236_p3 = scmp.ne.s32.totalorder %s1114_s14, %s1110_s13  ;;  %p237_p4 = scmp.eq.s32.totalorder %s845_s18, 5 }
   0xb   : > { %s1223_s22 = scalar_select %p218_p1, %s1118_s15, %s220_s20  }
   0xc   : > { %p1225_p5 = por %p231_p2, %p230_p0  ;;  %p1229_p6 = por %p237_p4, %p236_p3 }
   0xd   : > { %p847_p7 = scmp.ge.s32.totalorder %s1122_s16, 1  ;;  %p308_p8 = scmp.lt.s32.totalorder %s1122_s16, 7 }
   0xf   : > { %p309_p9 = pnand %p847_p7, %p308_p8 }
  0x10   : > { %s1431_s25 = sand.u32 (!%p309_p9), 1, %s1114_s14   ;;  %p345_p10 = scmp.lt.s32.totalorder (!%p309_p9), %s1208_s17, 5 }
  0x11   : > { %312 = sbr.rel (%p309_p9) target bundleno = 1468 (0x5bc), region = 56  ;;  %s1239_s26 = sshll.u32 (!%p309_p9), %s1431_s25, 1 }
  0x12   : > { %s1436_s10 = sld [smem:[#allocation8_spill]] (!%p309_p9)  ;;  %p850_p11 = scmp.ne.s32.totalorder (!%p309_p9), %s1208_s17, 0 }
  0x18   : > { %s346_s27 = scalar_select %p345_p10, %s1208_s17, 5 }
  0x19   : > { %352 = sbr.rel (%p850_p11) target bundleno = 33 (0x21), region = 60  ;;  %v353_v0 = vld [vmem:[%s1421_s1] sm:$0x3] (!%p850_p11)  ;;  %vm354_vm0 = vcmask (!%p850_p11), 254976   ;;  %s1437_s0 = sld [smem:[#allocation7_spill]] (!%p850_p11) }
  0x1a   : > { %s849_s28 = sshll.u32 %s346_s27, 1  ;;  %355 = vst.msk [vmem:[#allocation2] sm:$0x3] (!%p850_p11), %vm354_vm0, %v353_v0 }
  0x1b   : > { %s1245_s11 = scalar_lea.vmem %s1436_s10, %s849_s28 }
  0x1f   : > { %v356_v1 = vld [vmem:[%s1437_s0] sm:$0x3] (!%p850_p11) }
  0x20   : > { %357 = vst.msk [vmem:[#allocation3] sm:$0x3] %vm354_vm0, %v356_v1 }
  0x21 PF: > { %v360_v2 = vld [vmem:[%s1423_s3] sm:$0xff]  ;;  %v361_v3 = vld [vmem:[%s1423_s3 + $0x8] sm:$0xff]  ;;  %v362_v4 = vld [vmem:[%s1423_s3 + $0x10] sm:$0xff]  ;;  %v1124_v5 = vmov 0.0|0.0   ;;  %vm1125_vm1 = vmmov 0   ;;  %v1126_v8 = vmov 0.0  }
  0x22   : > { %964 = vmatprep.subr.bf16.mxu0 %v1124_v5  ;;  %v965_v6 = vpack.c.bf16 %v361_v3, %v360_v2  ;;  %v363_v7 = vld [vmem:[%s1423_s3 + $0x18] sm:$0xff]  ;;  %904 = vmatprep.mubr.msk.f32.mxu0 %vm1125_vm1, %v1126_v8  ;;  %v445_v10 = vld [vmem:[%s1424_s4] sm:$0xff]  ;;  %v446_v11 = vld [vmem:[%s1424_s4 + $0x8] sm:$0xff]  ;;  %vm371_vm2 = vcmask 261120   ;;  %s1127_s10 = smov 64   ;;  %s1129_s20 = smov 32  }
  0x23   : > { %982 = vmatprep.subr.bf16.mxu1 %v1124_v5  ;;  %961 = vmatprep.mubr.msk.f32.mxu1 %vm1125_vm1, %v1126_v8  ;;  %v968_v9 = vpack.c.bf16 %v363_v7, %v362_v4  ;;  %v971_v13 = vpack.c.bf16 %v446_v11, %v445_v10  ;;  %v447_v14 = vld [vmem:[%s1424_s4 + $0x10] sm:$0xff]  ;;  %v448_v15 = vld [vmem:[%s1424_s4 + $0x18] sm:$0xff]  ;;  %v359_v17 = vld [vmem:[#allocation2] sm:$0x3]  ;;  %vm562_vm3 = vcmask 254976   ;;  %vm650_vm4 = vcmask 1041408  }
  0x24   : > { %966 = vmatpush3.bf16.msra.mxu0 %v965_v6  ;;  %v974_v16 = vpack.c.bf16 %v448_v15, %v447_v14  ;;  %v853_v20 = vld [vmem:[%s1426_s6] ss:$0 sm:$0xff]  ;;  %v565_v36 = vld [vmem:[%s1427_s7 + $0x8] sm:$0xff]  ;;  %v566_v37 = vld [vmem:[%s1427_s7 + $0x10] sm:$0xff]  ;;  %s1438_s29 = scalar_lea.vmem [#allocation4], %s1239_s26  ;;  %vm661_vm6 = vcmask 1024  }
  0x25   : > { %967 = vmatprep.subr.bf16.mxu0 %v1124_v5  ;;  %v851_v24 = vld [vmem:[%s1425_s5] ss:$0 sm:$0xff]  ;;  %v567_v39 = vld [vmem:[%s1427_s7 + $0x18] sm:$0xff]  ;;  %v667_v55 = vld [vmem:[%s1422_s2 + $0x8] sm:$0xff]  ;;  %s861_s25 = sshll.u32 %s1208_s17, 5  ;;  %s1439_s18 = scalar_lea.vmem [#allocation4], %s1239_s26 }
  0x26   : > { %v564_v35 = vld [vmem:[%s1427_s7] sm:$0xff]  ;;  %v980_v40 = vpack.c.bf16 %v567_v39, %v566_v37  ;;  %v668_v56 = vld [vmem:[%s1422_s2 + $0x10] sm:$0xff]  ;;  %v669_v58 = vld [vmem:[%s1422_s2 + $0x18] sm:$0xff]  ;;  %s771_s12 = sshll.u32 %s1439_s18, 4  ;;  %s1381_s21 = scalar_lea.hbm %s1429_s9, %s861_s25  ;;  %s772_s12 = int_to_ptr.vmem [resolvable:$true] %s771_s12 }
  0x27   : > { %v358_v12 = vld [vmem:[#allocation3] sm:$0x3]  ;;  %v977_v38 = vpack.c.bf16 %v565_v36, %v564_v35  ;;  %v856_v49 = vld [vmem:[%s1428_s8] ss:$0 sm:$0xff]  ;;  %v986_v59 = vpack.c.bf16 %v669_v58, %v668_v56  ;;  %v671_v61 = vld [vmem:[%s1422_s2 + $0x28] sm:$0xff]  ;;  %s1440_s27 = sand.u32 1, %s1114_s14  }
  0x28   : > { %969 = vmatpush3.bf16.msra.mxu0 %v968_v9  ;;  %v666_v54 = vld [vmem:[%s1422_s2] sm:$0xff]  ;;  %v672_v63 = vld [vmem:[%s1422_s2 + $0x30] sm:$0xff]  ;;  %v673_v0 = vld [vmem:[%s1422_s2 + $0x38] sm:$0xff]  ;;  %s1060_s28 = scalar_lea.vmem %s772_s12, 32 }
  0x29   : > { %970 = vmatprep.subr.bf16.mxu0 %v1124_v5  ;;  %v983_v57 = vpack.c.bf16 %v667_v55, %v666_v54  ;;  %v670_v60 = vld [vmem:[%s1422_s2 + $0x20] sm:$0xff]  ;;  %v992_v1 = vpack.c.bf16 %v673_v0, %v672_v63  ;;  %v675_v3 = vld [vmem:[%s1422_s2 + $0x48] sm:$0xff]  ;;  %v676_v6 = vld [vmem:[%s1422_s2 + $0x50] sm:$0xff]  ;;  %p1061_p12 = scmp.ne.s32.totalorder %s772_s12, %s1060_s28 }
  0x2a   : > { %v989_v62 = vpack.c.bf16 %v671_v61, %v670_v60  ;;  %v674_v2 = vld [vmem:[%s1422_s2 + $0x40] sm:$0xff]  ;;  %v677_v7 = vld [vmem:[%s1422_s2 + $0x58] sm:$0xff]  ;;  %v679_v10 = vld [vmem:[%s1422_s2 + $0x68] sm:$0xff] }
  0x2b   : > { %905 = vmatmul.mubr.msk.f32.vlgmr.msra.gmra.mrb[0].mxu0 %vm371_vm2, %v358_v12  ;;  %984 = vmatpush3.bf16.msra.mxu1 %v983_v57  ;;  %v995_v4 = vpack.c.bf16 %v675_v3, %v674_v2  ;;  %v678_v9 = vld [vmem:[%s1422_s2 + $0x60] sm:$0xff]  ;;  %v648_v12 = vlaneseq  ;;  %p1062_p13 = pnand %p1061_p12, %p1225_p5 }
  0x2c   : > { %972 = vmatpush3.bf16.msra.mxu0 %v971_v13  ;;  %915 = vmatprep.mubr.msk.f32.mxu0 %vm1125_vm1, %v1126_v8  ;;  %v1001_v11 = vpack.c.bf16 %v679_v10, %v678_v9 }
  0x2d   : > { %973 = vmatprep.subr.bf16.mxu0 %v1124_v5  ;;  %985 = vmatprep.subr.bf16.mxu1 %v1124_v5  ;;  %v649_v13 = vand.u32 127, %v648_v12  ;;  %p1063_p0 = pneg %p1062_p13 }
  0x2f   : > { %987 = vmatpush3.bf16.msra.mxu1 %v986_v59  ;;  %v655_v14 = vcvt.s32.f32 %v649_v13 }
  0x30   : > { %975 = vmatpush3.bf16.msra.mxu0 %v974_v16  ;;  %988 = vmatprep.subr.bf16.mxu1 %v1124_v5 }
  0x31   : > { %976 = vmatprep.subr.bf16.mxu0 %v1124_v5 }
  0x33   : > { %916 = vmatmul.mubr.msk.f32.vlgmr.msra.gmra.mrb[2].mxu0 %vm371_vm2, %v359_v17  ;;  %990 = vmatpush3.bf16.msra.mxu1 %v989_v62 }
  0x34   : > { %926 = vmatprep.mubr.msk.f32.mxu0 %vm1125_vm1, %v1126_v8  ;;  %978 = vmatpush3.bf16.msra.mxu0 %v977_v38  ;;  %v998_v8 = vpack.c.bf16 %v677_v7, %v676_v6 }
  0x35   : > { %979 = vmatprep.subr.bf16.mxu0 %v1124_v5  ;;  %991 = vmatprep.subr.bf16.mxu1 %v1124_v5 }
  0x37   : > { %993 = vmatpush3.bf16.msra.mxu1 %v992_v1 }
  0x38   : > { %981 = vmatpush3.bf16.msra.mxu0 %v980_v40  ;;  %994 = vmatprep.subr.bf16.mxu1 %v1124_v5 }
  0x3b   : > { %996 = vmatpush3.bf16.msra.mxu1 %v995_v4 }
  0x3c   : > { %997 = vmatprep.subr.bf16.mxu1 %v1124_v5 }
  0x3f   : > { %999 = vmatpush3.bf16.msra.mxu1 %v998_v8 }
  0x40   : > { %1000 = vmatprep.subr.bf16.mxu1 %v1124_v5 }
  0x43   : > { %1002 = vmatpush3.bf16.msra.mxu1 %v1001_v11 }
  0x44   : > { %1003 = vmatprep.subr.bf16.mxu1 %v1124_v5  ;;  %v681_v5 = vld [vmem:[%s1422_s2 + $0x78] sm:$0xff] }
  0xfe   : > { %v441_v18 = vpop.f32.mrb[0].mxu0 }
  0xff   : > { %v906_v19 = vpop.f32.mrb[1].mxu0  ;;  %v442_v25 = vadd.f32 %v851_v24, %v441_v18  ;;  %v680_v18 = vld [vmem:[%s1422_s2 + $0x70] sm:$0xff] }
 0x100   : > { %v1004_v19 = vpack.c.bf16 %v681_v5, %v680_v18 }
 0x102   : > { %1005 = vmatpush3.bf16.msra.mxu1 %v1004_v19 }
 0x106   : > { %v525_v21 = vpop.f32.mrb[2].mxu0 }
 0x107   : > { %v526_v22 = vadd.f32 %v853_v20, %v525_v21  ;;  %v917_v23 = vpop.f32.mrb[3].mxu0 }
 0x108   : > { %v1130_v23 = vmov 1.0  }
 0x109   : > { %537 = vrot.lane.b32.xlu0 %v526_v22, %s1127_s10  ;;  %v529_v26 = vadd.f32 %v526_v22, %v442_v25 }
 0x10b   : > { %v855_v27 = vmul.f32 -1.442695, %v529_v26 }
 0x10d   : > { %1054 = vpow2.f32 %v855_v27 }
 0x117   : > { %v1055_v28 = vpop.eup %1054 }
 0x118   : > { %v533_v29 = vadd.f32 1.0, %v1055_v28 }
 0x11a   : > { %1056 = vrcp.f32 %v533_v29 }
 0x124   : > { %v1057_v30 = vpop.eup %1056 }
 0x125   : > { %v547_v43 = vsub.f32 1.0, %v1057_v30 }
 0x17b   : > { %v538_v31 = vpop.permute.xlu0 %537 }
 0x17c   : > { %v540_v32 = vmul.f32 %v1057_v30, %v538_v31 }
 0x17e   : > { %542 = vrot.lane.b32.xlu0 %v540_v32, %s1127_s10  ;;  %s1128_s10 = smov 96  }
 0x1f0   : > { %v543_v33 = vpop.permute.xlu0 %542 }
 0x1f1   : > { %v545_v34 = vadd.f32 %v543_v33, %v442_v25 }
 0x1f3   : > { %1058 = vtanh.f32 %v545_v34 }
 0x1fd   : > { %v1059_v41 = vpop.eup %1058 }
 0x1fe   : > { %549 = vrot.lane.b32.xlu1 %v1059_v41, %s1128_s10 }
 0x202   : > { %553 = vrot.lane.b32.xlu1 %v359_v17, %s1129_s20 }
 0x270   : > { %v550_v42 = vpop.permute.xlu1 %549 }
 0x271   : > { %v552_v45 = vmul.f32 %v550_v42, %v547_v43 }
 0x274   : > { %v554_v44 = vpop.permute.xlu1 %553 }
 0x275   : > { %v556_v46 = vmul.f32 %v1057_v30, %v554_v44 }
 0x277   : > { %v557_v47 = vadd.f32 %v556_v46, %v552_v45 }
 0x279   : > { %559 = vrot.lane.b32.xlu0 %v557_v47, %s1128_s10 }
 0x2eb   : > { %v560_v48 = vpop.permute.xlu0 %559 }
 0x2ec   : > { %563 = vst.msk [vmem:[#allocation2] sm:$0x3] %vm562_vm3, %v560_v48  ;;  %927 = vmatmul.mubr.msk.f32.vlgmr.msra.gmra.mrb[4].mxu0 %vm371_vm2, %v560_v48 }
 0x3bf   : > { %v643_v50 = vpop.f32.mrb[4].mxu0 }
 0x3c0   : > { %v644_v51 = vadd.f32 %v856_v49, %v643_v50  ;;  %v928_v52 = vpop.f32.mrb[5].mxu0 }
 0x3c2   : > { %647 = vst [vmem:[%s1438_s29] sm:$0x3] %v644_v51  ;;  %v651_v53 = vsel %vm650_vm4, %v644_v51, -inf  ;;  %s754_s29 = scalar_lea.sflag [#allocation5], %s1440_s27 }
 0x3c3   : > { %652 = vmax.xlane.f32.xlu1 %v651_v53 }
 0x450   : > { %v653_v15 = vpop.xlane.xlu1 %652 }
 0x451   : > { %vm654_vm5 = vcmp.eq.f32.partialorder %v644_v51, %v653_v15 }
 0x452   : > { %v656_v16 = vsel %vm654_vm5, %v655_v14, 128.0 }
 0x453   : > { %v657_v17 = vsel %vm650_vm4, %v656_v16, inf }
 0x454   : > { %658 = vmin.xlane.f32.xlu0 %v657_v17 }
 0x4e1   : > { %v659_v20 = vpop.xlane.xlu0 %658 }
 0x4e2   : > { %v1006_v21 = vtrunc.f32 %v659_v20 }
 0x4e4   : > { %v1007_v22 = vcvt.f32.s32 %v1006_v21 }
 0x4e6   : > { %662 = vst.msk [vmem:[%s1245_s11] sm:$0x3] %vm661_vm6, %v1007_v22  ;;  %vm663_vm7 = vcmp.eq.s32.totalorder %v649_v13, %v1007_v22  ;;  %s1131_s11 = smov [#allocation4]  }
 0x4e7   : > { %962 = vmatmul.mubr.msk.f32.vlgmr.msra.gmra.mrb[0].mxu1 %vm663_vm7, %v1130_v23  ;;  %s1064_s30 = sshll.u32 %s1131_s11, 4  ;;  %s1065_s30 = int_to_ptr.vmem [resolvable:$false] %s1064_s30 }
 0x4e8   : > { %s1066_s0 = scalar_lea.vmem %s1065_s30, 64  ;;  %p1067_p1 = scmp.lt.s32.totalorder %s772_s12, %s1065_s30 }
 0x4e9   : > { %p1068_p2 = scmp.lt.s32.totalorder %s1066_s0, %s1060_s28 }
 0x4eb   : > { %p1069_p3 = por %p1068_p2, %p1067_p1 }
 0x4ed   : > { %p1070_p4 = pnand %p1069_p3, %p1063_p0 }
 0x4ef   : > { %1073 = shalt.err (!%p1070_p4)
}
 0x4f0   : > { %s1074_s17 = scalar_lea.hbm %s1381_s21, 32  ;;  %s1078_s18 = scalar_lea.hbm %s1429_s9, 192 }
 0x4f1   : > { %p1075_p7 = scmp.ne.s32.totalorder %s1381_s21, %s1074_s17  ;;  %p1079_p10 = scmp.lt.u32.totalorder %s1381_s21, %s1429_s9 }
 0x4f2   : > { %p1080_p11 = scmp.lt.u32.totalorder %s1078_s18, %s1074_s17  ;;  %p1082_p13 = scmp.lt.u32.totalorder %s1074_s17, %s1381_s21 }
 0x4f3   : > { %p1076_p8 = pnand %p1075_p7, %p1225_p5 }
 0x4f4   : > { %p1081_p12 = por %p1080_p11, %p1079_p10 }
 0x4f5   : > { %p1077_p9 = pneg %p1076_p8 }
 0x4f6   : > { %p1083_p0 = por %p1082_p13, %p1081_p12 }
 0x4f8   : > { %p1084_p1 = pnand %p1083_p0, %p1077_p9 }
 0x4fa   : > { %1087 = shalt.err (!%p1084_p1)
}
 0x4fb   : > { %1008 = dma.vmem_to_hbm [thread:$0]  (%p1225_p5), %s772_s12, 32, %s1381_s21, %s754_s29  }
 0x5ba   : > { %v748_v24 = vpop.f32.mrb[0].mxu1 }
 0x5bb   : > { %752 = vst.msk [vmem:[#allocation3] sm:$0x3] %vm562_vm3, %v748_v24  ;;  %v963_v25 = vpop.f32.mrb[1].mxu1 }
 0x5bc PF: > { %p1014_p2 = scmp.ge.s32.totalorder %s1122_s16, 2  ;;  %s786_s0 = sand.u32 1, %s1110_s13  }
 0x5bd   : > { %s787_s27 = scalar_lea.sflag [#allocation5], %s786_s0 }
 0x5be   : > { %p1011_p3 = pnand %p1014_p2, %p1229_p6 }
 0x5c0   : > { %1105 = dma.done.wait (!%p1011_p3), %s787_s27, 32  }
 0x5c1   : > { %1107 = vsyncadd (!%p1011_p3), %s787_s27, 4294967264  ;;  %p21_p5 = scmp.ge.s32.totalorder %s1212_s19, 8   ;;  %s1441_s13 = smov %s1114_s14 }
 0x5c2   : > { %s1442_s14 = smov %s1118_s15  ;;  %s1443_s15 = smov %s1223_s22 }
 0x5c3   : > { %s1444_s16 = smov %s1212_s19  ;;  %23 = sbr.rel (!%p21_p5) target bundleno = 6 (0x6), region = 104 }
 0x5ca   :  { %799 = vsyncpa [#allocation5], 1 }
 0x5cb   :  { %801 = vsyncpa [#allocation5 + $0x1], 1 }

</bundles_post_ra>
